<compile_context>
chip_gen: v7x
topology: tpu7x:2x2x1
jax: 0.10.0
libtpu: 0.0.40
codegen_flags: <defaults>
</compile_context>

<pallas_src>
import math

import jax
import jax.numpy as jnp
import numpy as np
from jax.experimental import pallas as pl
from jax.experimental.pallas import tpu as pltpu


def _hyper_graph_conv_kernel(x_ref, m_ref, wt_ref, b_ref, o_ref):
    """Fused HyperGraphConv forward for one batch tile (lane-dense layouts).

      x_ref  : (Bblk, Cin, T*N)        lane-dense NCHW input slab
      m_ref  : (T*N, T*N)              fused mixing operator I + I⊗Gs + Gt⊗I
      wt_ref : (Bblk, Cout, Cin)       (diag(gamma)·W)ᵀ, pre-broadcast over Bblk
      b_ref  : (Cout, 1)               beta·W + b   (affine folded in)
      o_ref  : (Bblk, Cout, T*N)       lane-dense NCHW output slab
    """
    bblk, cin, tn = x_ref.shape

    # Hypergraph mixing: one wide, lane-dense MXU matmul with M-dim = Bblk*Cin
    # rows (the leading-dim merge is a cheap layout no-op).
    x2 = x_ref[...].reshape(bblk * cin, tn)                       # (Bblk*Cin, TN)
    z = jnp.dot(x2, m_ref[...],
                preferred_element_type=jnp.float32)               # f32 accum

    # Channel transform (gamma/beta already folded into Wt / b2).  wt_ref is
    # pre-broadcast to (Bblk, Cout, Cin) in the wrapper so the batched
    # dot_general's natural output order is already (Bblk, Cout, TN): no
    # in-kernel transpose or relayout, and the store is a full-width vst.
    z3 = z.reshape(bblk, cin, tn).astype(wt_ref.dtype)
    y = jnp.einsum('boc,bcn->bon', wt_ref[...], z3,
                   preferred_element_type=jnp.float32) + b_ref[...]
    o_ref[...] = y.astype(o_ref.dtype)


def _default_mxu_dtype():
    """bf16 MXU operands on v6e/v7x (bf16 VPU, 256x256 MXU fast path); f32 on
    v5e and older (no bf16 VPU → cast round-trips cost more than they save).
    v7x has no int MXU path, so bf16 is also the right quantized choice there."""
    try:
        kind = jax.devices()[0].device_kind.lower()
    except Exception:
        return None
    if ("v6" in kind) or ("v7" in kind) or ("tpu7" in kind):
        return jnp.bfloat16
    return None


def _pick_bblk(B, Cin):
    """Batch-tile size: smallest divisor of B whose Bblk*Cin fills the MXU row
    dimension (>=256); if the whole batch is too small for that, take it all in
    one grid step to amortize the ~0.35 us per-step overhead.  At realistic
    batch sizes this still leaves >=2 (even) grid steps so the "parallel" batch
    axis feeds both v7x TensorCores."""
    divisors = [d for d in range(1, B + 1) if B % d == 0]
    for d in divisors:
        if d * Cin >= 256:
            return d
    return divisors[-1]


def hypergraph_conv(x_nchw, Hs, Ht, gamma, beta, W, b, *,
                    mxu_dtype="auto", bblk=None):
    """HyperGraphConv forward: (B, C_in, T, N) -> (B, C_out, T, N).

    mxu_dtype: "auto" (bf16 on v6e/v7x, f32 otherwise), None (f32 everywhere),
    or an explicit dtype for the MXU operands.  Accumulation stays f32.
    """
    B, Cin, T, N = x_nchw.shape
    TN = T * N
    Cout = W.shape[1]
    out_dtype = x_nchw.dtype
    f32 = jnp.float32

    if mxu_dtype == "auto":
        mxu_dtype = _default_mxu_dtype()
    if bblk is None:
        bblk = _pick_bblk(B, Cin)
    assert B % bblk == 0, (B, bblk)

    # Fused hypergraph mixing operator (symmetric Grams — see module docstring):
    #   z_flat = x_flat @ M,  M = I_{TN} + I_T ⊗ (Hs·Hsᵀ) + (Ht·Htᵀ) ⊗ I_N
    Gs = (Hs @ Hs.T).astype(f32)                               # (N, N)
    Gt = (Ht @ Ht.T).astype(f32)                               # (T, T)
    M = (jnp.eye(TN, dtype=f32)
         + jnp.kron(jnp.eye(T, dtype=f32), Gs)
         + jnp.kron(Gt, jnp.eye(N, dtype=f32)))                # (TN, TN)

    # Fold HyperNet's per-channel affine into the Linear:
    #   ((z*gamma + beta) @ W + b) == z @ (diag(gamma)·W) + (beta·W + b)
    Wt = (gamma[:, None] * W).T.astype(f32)                    # (Cout, Cin)
    wt_b = jnp.broadcast_to(Wt, (bblk, Cout, Cin))             # batched form
    b2 = (beta @ W + b).astype(f32).reshape(Cout, 1)

    # Free contiguous reshape to the lane-dense (B, Cin, T*N) layout.
    x_in = x_nchw.reshape(B, Cin, TN)
    if mxu_dtype is not None:
        x_in = x_in.astype(mxu_dtype)
        M = M.astype(mxu_dtype)
        wt_b = wt_b.astype(mxu_dtype)

    # NOTE: M / wt_b / b2 are grid-invariant (constant index_map) and tiny
    # (64 KiB total here), so default double-buffering costs nothing; revisit
    # with pl.Buffered(1) only if the dense operator grows on v7x (64 MiB VMEM).
    out = pl.pallas_call(
        _hyper_graph_conv_kernel,
        out_shape=jax.ShapeDtypeStruct((B, Cout, TN), out_dtype),
        grid_spec=pltpu.PrefetchScalarGridSpec(
            num_scalar_prefetch=0,
            grid=(B // bblk,),
            in_specs=[
                pl.BlockSpec((bblk, Cin, TN), lambda i: (i, 0, 0)),
                pl.BlockSpec((TN, TN), lambda i: (0, 0)),
                pl.BlockSpec((bblk, Cout, Cin), lambda i: (0, 0, 0)),
                pl.BlockSpec((Cout, 1), lambda i: (0, 0)),
            ],
            out_specs=pl.BlockSpec((bblk, Cout, TN), lambda i: (i, 0, 0)),
        ),
        compiler_params=pltpu.CompilerParams(
            dimension_semantics=("parallel",),
            vmem_limit_bytes=32 * 1024 * 1024),
    )(x_in, M, wt_b, b2)

    # Free reshape back to NCHW — no wrapper transpose on either side.
    return out.reshape(B, Cout, T, N)


def reference(x_nchw, Hs, Ht, gamma, beta, W, b):
    """Pure-JAX reference mirroring the PyTorch forward (for verification)."""
    x = jnp.transpose(x_nchw, (0, 2, 3, 1))              # (B, T, N, Cin)
    gs = Hs @ Hs.T
    gt = Ht @ Ht.T
    xs = jnp.einsum('nm,btmc->btnc', gs, x)
    xt = jnp.einsum('ts,bsnc->btnc', gt, x)
    z = (x + xs + xt) * gamma + beta
    y = jnp.einsum('btnc,cd->btnd', z, W) + b
    return jnp.transpose(y, (0, 3, 1, 2))                # (B, Cout, T, N)


if __name__ == "__main__":
    # Small shapes consistent with the module: gso is (N, N); HyperNet takes
    # (n_vertex=N, T_length=T, c_in, Sk, Tk).  T*N = 128 → lane-dense slabs.
    B, Cin, Cout, T, N, Sk, Tk = 2, 4, 8, 8, 16, 3, 2

    key = jax.random.PRNGKey(0)
    kx, khs, kht, kg, kbt, kw, kb = jax.random.split(key, 7)

    x = jax.random.normal(kx, (B, Cin, T, N), dtype=jnp.float32)

    # Hypergraph incidence matrices (HyperNet parameters), deterministic init.
    Hs = jax.random.uniform(khs, (N, Sk), dtype=jnp.float32) / Sk
    Ht = jax.random.uniform(kht, (T, Tk), dtype=jnp.float32) / Tk

    # Non-trivial affine (gamma/beta) so the folded form is actually exercised.
    gamma = 1.0 + 0.1 * jax.random.normal(kg, (Cin,), dtype=jnp.float32)
    beta = 0.1 * jax.random.normal(kbt, (Cin,), dtype=jnp.float32)

    # c_transform Linear init, mimicking kaiming_uniform_(a=sqrt(5)):
    bound = 1.0 / math.sqrt(Cin)
    W = jax.random.uniform(kw, (Cin, Cout), dtype=jnp.float32,
                           minval=-bound, maxval=bound)
    b = jax.random.uniform(kb, (Cout,), dtype=jnp.float32,
                           minval=-bound, maxval=bound)

    ref = reference(x, Hs, Ht, gamma, beta, W, b)

    # 1) Strict check on the f32 MXU path.
    out = hypergraph_conv(x, Hs, Ht, gamma, beta, W, b, mxu_dtype=None)
    out = jax.block_until_ready(out)
    assert out.shape == (B, Cout, T, N), out.shape
    np.testing.assert_allclose(np.asarray(out), np.asarray(ref),
                               rtol=1e-5, atol=2e-5)

    # 2) Generation-default path (bf16 operands on v6e/v7x, f32 elsewhere) —
    #    looser tolerance since bf16 operands truncate between matmul stages.
    out2 = jax.block_until_ready(hypergraph_conv(x, Hs, Ht, gamma, beta, W, b))
    np.testing.assert_allclose(np.asarray(out2), np.asarray(ref),
                               rtol=5e-2, atol=5e-2)

    print("KERNEL_OK")
</pallas_src>

<mosaic_0001>
module attributes {stable_mosaic.version = 11 : i64} {
  func.func @_hyper_graph_conv_kernel(%arg0: i32, %arg1: memref<2x4x128xf32, #tpu.memory_space<vmem>>, %arg2: memref<128x128xf32, #tpu.memory_space<vmem>>, %arg3: memref<2x8x4xf32, #tpu.memory_space<vmem>>, %arg4: memref<8x1xf32, #tpu.memory_space<vmem>>, %arg5: memref<2x8x128xf32, #tpu.memory_space<vmem>>) attributes {dimension_semantics = [#tpu.dimension_semantics<parallel>], iteration_bounds = array<i64: 1>, scalar_prefetch = 0 : i64, scratch_operands = 0 : i64, tpu.core_type = #tpu.core_type<tc>, window_params = [{transform_indices = @transform_0, window_bounds = array<i64: 2, 4, 128>}, {pipeline_mode = #tpu.pipeline_mode<synchronous>, transform_indices = @transform_1, window_bounds = array<i64: 128, 128>}, {pipeline_mode = #tpu.pipeline_mode<synchronous>, transform_indices = @transform_2, window_bounds = array<i64: 2, 8, 4>}, {pipeline_mode = #tpu.pipeline_mode<synchronous>, transform_indices = @transform_3, window_bounds = array<i64: 8, 1>}, {transform_indices = @transform_4, window_bounds = array<i64: 2, 8, 128>}]} {
    %c0 = arith.constant 0 : index
    %c0_0 = arith.constant 0 : index
    %c0_1 = arith.constant 0 : index
    %0 = vector.load %arg1[%c0, %c0_0, %c0_1] : memref<2x4x128xf32, #tpu.memory_space<vmem>>, vector<2x4x128xf32>
    %1 = vector.shape_cast %0 : vector<2x4x128xf32> to vector<8x128xf32>
    %c0_2 = arith.constant 0 : index
    %c0_3 = arith.constant 0 : index
    %2 = vector.load %arg2[%c0_2, %c0_3] : memref<128x128xf32, #tpu.memory_space<vmem>>, vector<128x128xf32>
    %cst = arith.constant dense<0.000000e+00> : vector<8x128xf32>
    %3 = tpu.matmul %1, %2, %cst {dimension_numbers = #tpu.dot_dimension_numbers<[1], [0], [0], [1], [0, 0, 1, 1], [], []>} : vector<8x128xf32>, vector<128x128xf32>, vector<8x128xf32> -> vector<8x128xf32>
    %4 = vector.shape_cast %3 : vector<8x128xf32> to vector<2x4x128xf32>
    %c0_4 = arith.constant 0 : index
    %c0_5 = arith.constant 0 : index
    %c0_6 = arith.constant 0 : index
    %5 = vector.load %arg3[%c0_4, %c0_5, %c0_6] : memref<2x8x4xf32, #tpu.memory_space<vmem>>, vector<2x8x4xf32>
    "tpu.trace_start"() <{level = 10 : i32, message = "boc,bcn->bon"}> : () -> ()
    %cst_7 = arith.constant dense<0.000000e+00> : vector<2x8x128xf32>
    %6 = tpu.matmul %5, %4, %cst_7 {dimension_numbers = #tpu.dot_dimension_numbers<[2], [1], [1], [2], [0, 0, 0, 1, 1, 2], [0], [0]>} : vector<2x8x4xf32>, vector<2x4x128xf32>, vector<2x8x128xf32> -> vector<2x8x128xf32>
    "tpu.trace_stop"() : () -> ()
    %c0_8 = arith.constant 0 : index
    %c0_9 = arith.constant 0 : index
    %7 = vector.load %arg4[%c0_8, %c0_9] : memref<8x1xf32, #tpu.memory_space<vmem>>, vector<8x1xf32>
    %8 = vector.shape_cast %7 : vector<8x1xf32> to vector<1x8x1xf32>
    %9 = vector.broadcast %8 : vector<1x8x1xf32> to vector<2x8x128xf32>
    %10 = arith.addf %6, %9 : vector<2x8x128xf32>
    %c0_10 = arith.constant 0 : index
    %c0_11 = arith.constant 0 : index
    %c0_12 = arith.constant 0 : index
    %11 = vector.load %arg5[%c0_10, %c0_11, %c0_12] : memref<2x8x128xf32, #tpu.memory_space<vmem>>, vector<2x8x128xf32>
    tpu.vector_store %arg5[%c0_10, %c0_11, %c0_12], %10 {strides = array<i32>} : memref<2x8x128xf32, #tpu.memory_space<vmem>>, vector<2x8x128xf32>,
    return
  }
  func.func @transform_0(%arg0: i32) -> (i32, i32, i32) {
    %c0_i32 = arith.constant 0 : i32
    %c0_i32_0 = arith.constant 0 : i32
    %c0_i32_1 = arith.constant 0 : i32
    return %arg0, %c0_i32, %c0_i32_0 : i32, i32, i32
  }
  func.func @transform_1(%arg0: i32) -> (i32, i32) {
    %c0_i32 = arith.constant 0 : i32
    %c0_i32_0 = arith.constant 0 : i32
    %c0_i32_1 = arith.constant 0 : i32
    return %c0_i32, %c0_i32_0 : i32, i32
  }
  func.func @transform_2(%arg0: i32) -> (i32, i32, i32) {
    %c0_i32 = arith.constant 0 : i32
    %c0_i32_0 = arith.constant 0 : i32
    %c0_i32_1 = arith.constant 0 : i32
    %c0_i32_2 = arith.constant 0 : i32
    return %c0_i32, %c0_i32_0, %c0_i32_1 : i32, i32, i32
  }
  func.func @transform_3(%arg0: i32) -> (i32, i32) {
    %c0_i32 = arith.constant 0 : i32
    %c0_i32_0 = arith.constant 0 : i32
    %c0_i32_1 = arith.constant 0 : i32
    return %c0_i32, %c0_i32_0 : i32, i32
  }
  func.func @transform_4(%arg0: i32) -> (i32, i32, i32) {
    %c0_i32 = arith.constant 0 : i32
    %c0_i32_0 = arith.constant 0 : i32
    %c0_i32_1 = arith.constant 0 : i32
    return %arg0, %c0_i32, %c0_i32_0 : i32, i32, i32
  }
}

</mosaic_0001>

<bundles_post_ra>
// kernel: tpu_custom_call.1
= control target key start
LH: loop header
LB: loop body
LE: loop exit
PB: predicated region body
PF: predicated region fallthrough
CT: control target
= control target key end

     0   :  { %9 = vsyncpa [#allocation3], 0  ;;  %s535_s0 = inlined_call_operand.vmem [shape: f32[2,4,128], index: 0, kind: input, shape index: {}]   ;;  %s536_s1 = inlined_call_operand.hbm [shape: f32[128,128], index: 1, kind: input, shape index: {}]   ;;  %s537_s2 = inlined_call_operand.vmem [shape: f32[2,8,4], index: 2, kind: input, shape index: {}]   ;;  %s538_s3 = inlined_call_operand.vmem [shape: f32[8,1], index: 3, kind: input, shape index: {}]   ;;  %s539_s4 = inlined_call_operand.hbm [shape: f32[2,8,128], index: 4, kind: output, shape index: {}]  }
   0x1   :  { %10 = vsyncpa [#allocation4], 0  ;;  %s457_s15 = smov [#allocation2]   ;;  %s409_s19 = scalar_lea.hbm %s536_s1, 2048 }
   0x2   :  { %s18_s16 = sshll.u32 %s457_s15, 4  ;;  %p410_p0 = scmp.ne.s32.totalorder %s536_s1, %s409_s19  ;;  %s19_s16 = int_to_ptr.vmem [resolvable:$true] %s18_s16 }
   0x3   :  { %p413_p1 = scmp.lt.u32.totalorder %s409_s19, %s536_s1 }
   0x5   :  { %p415_p2 = pnand %p413_p1, %p410_p0 }
   0x7   :  { %418 = shalt.err (!%p415_p2)
}
   0x8   :  { %s419_s24 = scalar_lea.vmem %s19_s16, 2048  ;;  %p424_p4 = scmp.lt.s32.totalorder %s19_s16, %s19_s16 }
   0x9   :  { %p420_p3 = scmp.ne.s32.totalorder %s19_s16, %s419_s24  ;;  %p425_p5 = scmp.lt.s32.totalorder %s419_s24, %s419_s24 }
   0xb   :  { %p426_p6 = por %p425_p5, %p424_p4 }
   0xd   :  { %p427_p7 = pnand %p426_p6, %p420_p3 }
   0xf   :  { %430 = shalt.err (!%p427_p7)
}
  0x10   :  { %s458_s25 = smov 128   ;;  %s459_s26 = smov 8  }
  0x11   :  { %24 = dma.hbm_to_vmem [thread:$0]  %s536_s1, 2048, %s19_s16, [#allocation3], %s458_s25, %s458_s25, %s459_s26  }
  0x12   :  { %453 = dma.done.wait [#allocation3], 2048  }
  0x13   :  { %454 = vsyncadd [#allocation3], 4294965248  ;;  %v460_v0 = vmov 0.0|0.0   ;;  %vm461_vm0 = vmmov 0   ;;  %v462_v1 = vmov 0.0   ;;  %v34_v2 = vld [vmem:[#allocation2] sm:$0xff] }
  0x14   :  { %375 = vmatprep.subr.bf16.mxu0 %v460_v0  ;;  %362 = vmatprep.mubr.msk.f32.mxu0 %vm461_vm0, %v462_v1  ;;  %v35_v3 = vld [vmem:[#allocation2 + $0x8] sm:$0xff]  ;;  %v36_v4 = vld [vmem:[#allocation2 + $0x10] sm:$0xff]  ;;  %v37_v6 = vld [vmem:[#allocation2 + $0x18] sm:$0xff]  ;;  %v463_v28 = vmov 0   ;;  %vm138_vm1 = vcmask 1043456   ;;  %vm134_vm2 = vcmask 31744  }
  0x15   :  { %365 = vmatprep.subr.mxu1 %v462_v1  ;;  %367 = vmatprep.mubr.msk.f32.mxu1 %vm461_vm0, %v462_v1  ;;  %v376_v5 = vpack.c.bf16 %v35_v3, %v34_v2  ;;  %v379_v7 = vpack.c.bf16 %v37_v6, %v36_v4  ;;  %v38_v8 = vld [vmem:[#allocation2 + $0x20] sm:$0xff]  ;;  %v39_v9 = vld [vmem:[#allocation2 + $0x28] sm:$0xff]  ;;  %v40_v11 = vld [vmem:[#allocation2 + $0x30] sm:$0xff]  ;;  %s464_s8 = smov [#allocation5]  }
  0x16   :  { %v382_v10 = vpack.c.bf16 %v39_v9, %v38_v8  ;;  %v41_v12 = vld [vmem:[#allocation2 + $0x38] sm:$0xff]  ;;  %v42_v14 = vld [vmem:[#allocation2 + $0x40] sm:$0xff]  ;;  %v43_v15 = vld [vmem:[#allocation2 + $0x48] sm:$0xff]  ;;  %407 = vset.pattern.permute.xlu0 %v463_v28  ;;  %s293_s9 = sshll.u32 %s464_s8, 4  ;;  %s294_s9 = int_to_ptr.vmem [resolvable:$true] %s293_s9 }
  0x17   :  { %377 = vmatpush3.bf16.msra.mxu0 %v376_v5  ;;  %v385_v13 = vpack.c.bf16 %v41_v12, %v40_v11  ;;  %v388_v16 = vpack.c.bf16 %v43_v15, %v42_v14  ;;  %v44_v17 = vld [vmem:[#allocation2 + $0x50] sm:$0xff]  ;;  %v45_v18 = vld [vmem:[#allocation2 + $0x58] sm:$0xff]  ;;  %v46_v20 = vld [vmem:[#allocation2 + $0x60] sm:$0xff]  ;;  %s431_s10 = scalar_lea.vmem %s294_s9, 256  ;;  %p436_p9 = scmp.lt.s32.totalorder %s294_s9, %s294_s9 }
  0x18   :  { %378 = vmatprep.subr.bf16.mxu0 %v460_v0  ;;  %v391_v19 = vpack.c.bf16 %v45_v18, %v44_v17  ;;  %v47_v21 = vld [vmem:[#allocation2 + $0x68] sm:$0xff]  ;;  %v48_v23 = vld [vmem:[#allocation2 + $0x70] sm:$0xff]  ;;  %v49_v24 = vld [vmem:[#allocation2 + $0x78] sm:$0xff]  ;;  %p432_p8 = scmp.ne.s32.totalorder %s294_s9, %s431_s10  ;;  %p437_p10 = scmp.lt.s32.totalorder %s431_s10, %s431_s10 }
  0x19   :  { %v394_v22 = vpack.c.bf16 %v47_v21, %v46_v20  ;;  %v397_v25 = vpack.c.bf16 %v49_v24, %v48_v23  ;;  %v408_v26 = vld [vmem:[%s535_s0] sm:$0xff]   ;;  %v127_v33 = vld [vmem:[%s537_s2 + $0x8] sm:$0xff] }
  0x1a   :  { %v128_v27 = vld [vmem:[%s538_s3] sm:$0xff]  ;;  %p438_p11 = por %p437_p10, %p436_p9 }
  0x1b   :  { %380 = vmatpush3.bf16.msra.mxu0 %v379_v7  ;;  %131 = vperm.xlu0 %407, %v128_v27   ;;  %v126_v29 = vld [vmem:[%s537_s2] sm:$0xff] }
  0x1c   :  { %381 = vmatprep.subr.bf16.mxu0 %v460_v0  ;;  %p439_p12 = pnand %p438_p11, %p432_p8 }
  0x1f   :  { %383 = vmatpush3.bf16.msra.mxu0 %v382_v10 }
  0x20   :  { %384 = vmatprep.subr.bf16.mxu0 %v460_v0 }
  0x23   :  { %386 = vmatpush3.bf16.msra.mxu0 %v385_v13 }
  0x24   :  { %387 = vmatprep.subr.bf16.mxu0 %v460_v0 }
  0x27   :  { %389 = vmatpush3.bf16.msra.mxu0 %v388_v16 }
  0x28   :  { %390 = vmatprep.subr.bf16.mxu0 %v460_v0 }
  0x2b   :  { %392 = vmatpush3.bf16.msra.mxu0 %v391_v19 }
  0x2c   :  { %393 = vmatprep.subr.bf16.mxu0 %v460_v0 }
  0x2f   :  { %395 = vmatpush3.bf16.msra.mxu0 %v394_v22 }
  0x30   :  { %396 = vmatprep.subr.bf16.mxu0 %v460_v0 }
  0x33   :  { %398 = vmatpush3.bf16.msra.mxu0 %v397_v25 }
  0x36   :  { %363 = vmatmul.mubr.f32.vlgmr.msra.gmra.mrb[0].mxu0 %v408_v26 }
  0x9a   :  { %v132_v34 = vpop.permute.xlu0 %131 }
 0x109   :  { %v120_v30 = vpop.f32.mrb[0].mxu0 }
 0x10a   :  { %v125_v31 = vcombine.high %v120_v30, %v120_v30  ;;  %v364_v32 = vpop.f32.mrb[1].mxu0  ;;  %366 = vmatpush3.msk.msra.mxu1 %vm138_vm1, %v120_v30 }
 0x10b   :  { %368 = vmatmul.mubr.msk.f32.vlgmr.msra.gmra.mrb[0].mxu1 %vm134_vm2, %v126_v29  ;;  %370 = vmatprep.subr.mxu1 %v462_v1 }
 0x10c   :  { %371 = vmatpush3.msk.msra.mxu1 %vm138_vm1, %v125_v31  ;;  %372 = vmatprep.mubr.msk.f32.mxu1 %vm461_vm0, %v462_v1 }
 0x10f   :  { %373 = vmatmul.mubr.msk.f32.vlgmr.msra.gmra.mrb[2].mxu1 %vm134_vm2, %v127_v33 }
 0x1de   :  { %v207_v35 = vpop.f32.mrb[0].mxu1 }
 0x1df   :  { %v208_v36 = vadd.f32 %v207_v35, %v132_v34  ;;  %v369_v37 = vpop.f32.mrb[1].mxu1 }
 0x1e1   :  { %286 = vst [vmem:[#allocation5] sm:$0xff] %v208_v36 }
 0x1e2   :  { %v282_v38 = vpop.f32.mrb[2].mxu1 }
 0x1e3   :  { %v283_v39 = vadd.f32 %v282_v38, %v132_v34  ;;  %v374_v40 = vpop.f32.mrb[3].mxu1 }
 0x1e5   :  { %287 = vst [vmem:[#allocation5 + $0x8] sm:$0xff] %v283_v39 }
 0x1e6   :  { %442 = shalt.err (!%p439_p12)
}
 0x1e7   :  { %s443_s12 = scalar_lea.hbm %s539_s4, 256 }
 0x1e8   :  { %p444_p13 = scmp.ne.s32.totalorder %s539_s4, %s443_s12  ;;  %p447_p0 = scmp.lt.u32.totalorder %s443_s12, %s539_s4 }
 0x1ea   :  { %p449_p1 = pnand %p447_p0, %p444_p13 }
 0x1ec   :  { %452 = shalt.err (!%p449_p1)
}
 0x1ed   :  { %299 = dma.vmem_to_hbm [thread:$0]  %s294_s9, 256, %s539_s4, [#allocation4], %s458_s25, %s458_s25, %s459_s26  }
 0x1ee   :  { %455 = dma.done.wait [#allocation4], 256  }
 0x1ef   :  { %456 = vsyncadd [#allocation4], 4294967040 }
 0x1f0   :  { %303 = vsyncpa [#allocation3], 1 }
 0x1f1   :  { %304 = vsyncpa [#allocation4], 1 }

</bundles_post_ra>
